<compile_context>
chip_gen: v5e
topology: v5e:2x2
jax: 0.10.0
libtpu: 0.0.40
codegen_flags: <defaults>
</compile_context>

<pallas_src>
import math
from collections import namedtuple

import jax
import jax.numpy as jnp
import numpy as np
from jax.experimental import pallas as pl
from jax.experimental.pallas import tpu as pltpu


def _round_up(x, m):
    return ((x + m - 1) // m) * m


def _sublane(dtype):
    """Minimum second-to-last-dim tile granularity for a dtype (sublane packing)."""
    itemsize = jnp.dtype(dtype).itemsize
    return {4: 8, 2: 16, 1: 32}.get(itemsize, 8)


_K_SINGLE_STEP_MAX = 1024   # whole-K-in-one-tile threshold
_TK_MULTI = 512             # K tile when the K reduction needs a grid axis
_VMEM_TILE_BUDGET = 28 << 20


# ---------------------------------------------------------------------------
# Kernels
# ---------------------------------------------------------------------------
def _linear_kernel_single_k(x_ref, wt_ref, b_ref, o_ref):
    # Whole K resident in one tile: no accumulator scratch, no pl.when regions.
    # Bias already carries std_init / bias_init (folded at param-prep time).
    o_ref[...] = (
        jnp.dot(x_ref[...], wt_ref[...], preferred_element_type=jnp.float32)
        + b_ref[...]
    ).astype(o_ref.dtype)


def _linear_kernel_multi_k(x_ref, wt_ref, b_ref, o_ref, acc_ref):
    # x_ref: (tm, tk)  wt_ref: (tk, tn)  b_ref: (1, tn) f32  o_ref: (tm, tn)
    # acc_ref: (tm, tn) f32 accumulator, resident across the K ("arbitrary") axis.
    k = pl.program_id(2)

    @pl.when(k == 0)
    def _():
        # Seed with the pre-folded bias so the finalize is just cast+store.
        acc_ref[...] = jnp.broadcast_to(b_ref[...], acc_ref.shape).astype(jnp.float32)

    acc_ref[...] += jnp.dot(
        x_ref[...], wt_ref[...], preferred_element_type=jnp.float32
    )

    @pl.when(k == pl.num_programs(2) - 1)
    def _():
        o_ref[...] = acc_ref[...].astype(o_ref.dtype)


# ---------------------------------------------------------------------------
# Parameter preparation (call once at init time)
# ---------------------------------------------------------------------------
LinearParams = namedtuple("LinearParams", ["wt", "b2d", "out_dim"])


def prepare_linear_params(weight, bias, *, std_init=1.0, bias_init=0.0, dtype=None):
    """Fold std_init/bias_init into the params, pre-transpose and pre-pad the weight.

    weight: (out_dim, in_dim) PyTorch layout.  Returns LinearParams with:
      wt  : (Kp, Np) = transposed, scaled, zero-padded weight (Np multiple of 128)
      b2d : (1, Np)  f32 pre-folded bias (std_init*b + bias_init), zero-padded
      out_dim : logical N (for slicing the padded output columns off)
    Pass dtype=jnp.bfloat16 to trade accuracy for HBM bandwidth / MXU throughput.
    """
    out_dim, in_dim = weight.shape
    dtype = jnp.dtype(dtype or weight.dtype)

    wt = (float(std_init) * weight.astype(jnp.float32)).T.astype(dtype)      # (K, N)
    b2d = (float(std_init) * bias.astype(jnp.float32)
           + float(bias_init)).reshape(1, -1)                                # (1, N) f32

    Kp = in_dim if in_dim <= _K_SINGLE_STEP_MAX else _round_up(in_dim, _TK_MULTI)
    Np = _round_up(out_dim, 128)          # lane-dense output tiles -> unmasked vst
    if (Kp, Np) != wt.shape:
        wt = jnp.pad(wt, ((0, Kp - in_dim), (0, Np - out_dim)))
    if Np != out_dim:
        b2d = jnp.pad(b2d, ((0, 0), (0, Np - out_dim)))
    return LinearParams(wt=wt, b2d=b2d, out_dim=out_dim)


# ---------------------------------------------------------------------------
# Forward
# ---------------------------------------------------------------------------
def linear_layer_apply(x, params):
    """x: (..., K); params: LinearParams from prepare_linear_params."""
    wt, b2d, N = params.wt, params.b2d, params.out_dim
    Kp, Np = wt.shape
    K = x.shape[-1]
    lead_shape = x.shape[:-1]

    out_dtype = x.dtype
    # Explicit compute-dtype decision: activations follow the prepared weight dtype.
    if x.dtype != wt.dtype:
        x = x.astype(wt.dtype)

    x2d = x.reshape(-1, K)
    M = x2d.shape[0]

    sub = _sublane(wt.dtype)
    x_isz = jnp.dtype(wt.dtype).itemsize
    w_isz = jnp.dtype(wt.dtype).itemsize
    o_isz = jnp.dtype(out_dtype).itemsize

    # ---- K axis: single step when the whole (padded) K fits one tile ----------
    tk = Kp if Kp <= _K_SINGLE_STEP_MAX else _TK_MULTI
    grid_k = Kp // tk
    multi_k = grid_k > 1

    # ---- N axis: keep the whole weight resident when it is small --------------
    if Np <= 512 or Kp * Np * w_isz <= (8 << 20):
        tn = Np
    else:
        nb = Np // 128
        tn = 128 * next(c for c in (4, 3, 2, 1) if nb % c == 0)
    grid_n = Np // tn

    # ---- M axis: as large as the VMEM budget allows (kernel is overhead-bound) -
    fixed = 2 * tk * tn * w_isz + 2 * tn * 4                 # W double-buffer + bias
    per_row = 2 * tk * x_isz + 2 * tn * o_isz + (tn * 4 if multi_k else 0)
    tm = max(sub, min(1024, (_VMEM_TILE_BUDGET - fixed) // per_row,
                      _round_up(M, sub)))
    tm = max(sub, (tm // sub) * sub)
    # v7x megacore: ensure >= 2 parallel tiles when there is enough work.
    if grid_n == 1 and _round_up(M, tm) // tm == 1 and M >= 32 * sub:
        tm = max(sub, _round_up((M + 1) // 2, sub))
    Mp = _round_up(M, tm)
    grid_m = Mp // tm

    # ---- pad the activations only when unavoidable -----------------------------
    if (Mp, Kp) != x2d.shape:
        x2d = jnp.pad(x2d, ((0, Mp - M), (0, Kp - K)))

    cost = pl.CostEstimate(
        flops=2 * M * N * K,
        transcendentals=0,
        bytes_accessed=x_isz * M * K + w_isz * K * N + o_isz * M * N,
    )
    vmem_est = fixed + tm * per_row + (tm * tn * 4 if multi_k else 0)
    vmem_limit = int(min(max(2 * vmem_est, 16 << 20), 48 << 20))

    if multi_k:
        grid_spec = pltpu.PrefetchScalarGridSpec(
            num_scalar_prefetch=0,
            grid=(grid_m, grid_n, grid_k),
            in_specs=[
                pl.BlockSpec((tm, tk), lambda i, j, k: (i, k)),
                pl.BlockSpec((tk, tn), lambda i, j, k: (k, j)),
                pl.BlockSpec((1, tn), lambda i, j, k: (0, j)),
            ],
            out_specs=pl.BlockSpec((tm, tn), lambda i, j, k: (i, j)),
            scratch_shapes=[pltpu.VMEM((tm, tn), jnp.float32)],
        )
        semantics = ("parallel", "parallel", "arbitrary")
        kernel = _linear_kernel_multi_k
    else:
        grid_spec = pltpu.PrefetchScalarGridSpec(
            num_scalar_prefetch=0,
            grid=(grid_m, grid_n),
            in_specs=[
                pl.BlockSpec((tm, tk), lambda i, j: (i, 0)),
                pl.BlockSpec((tk, tn), lambda i, j: (0, j)),
                pl.BlockSpec((1, tn), lambda i, j: (0, j)),
            ],
            out_specs=pl.BlockSpec((tm, tn), lambda i, j: (i, j)),
        )
        semantics = ("parallel", "parallel")
        kernel = _linear_kernel_single_k

    out = pl.pallas_call(
        kernel,
        out_shape=jax.ShapeDtypeStruct((Mp, Np), out_dtype),
        grid_spec=grid_spec,
        compiler_params=pltpu.CompilerParams(
            dimension_semantics=semantics,
            vmem_limit_bytes=vmem_limit,
        ),
        cost_estimate=cost,
    )(x2d, wt, b2d)

    if (Mp, Np) != (M, N):
        out = out[:M, :N]
    return out.reshape(*lead_shape, N)


def linear_layer_forward(x, weight, bias, *, std_init=1.0, bias_init=0.0):
    """PyTorch-parity convenience wrapper: weight (out_dim, in_dim), bias (out_dim,).

    For production, call prepare_linear_params once at init and reuse its output so
    the transpose/scale/fold/pad is not redone every forward.
    """
    params = prepare_linear_params(weight, bias, std_init=std_init, bias_init=bias_init)
    return linear_layer_apply(x, params)


def init_linear_layer_params(key, in_dim, out_dim, *, freq_init=False, is_first=False):
    """Deterministic re-implementation of LinearLayer.__init__ parameter init."""
    wkey, bkey = jax.random.split(key)
    if is_first:
        bound = 1.0 / in_dim
        weight = jax.random.uniform(wkey, (out_dim, in_dim), jnp.float32, -bound, bound)
    elif freq_init:
        bound = math.sqrt(6.0 / in_dim) / 25.0
        weight = jax.random.uniform(wkey, (out_dim, in_dim), jnp.float32, -bound, bound)
    else:
        # 0.25 * kaiming_normal_(a=0.2, mode='fan_in', nonlinearity='leaky_relu')
        gain = math.sqrt(2.0 / (1.0 + 0.2 ** 2))
        std = gain / math.sqrt(in_dim)
        weight = 0.25 * std * jax.random.normal(wkey, (out_dim, in_dim), jnp.float32)
    b_bound = math.sqrt(1.0 / in_dim)
    bias = jax.random.uniform(bkey, (out_dim,), jnp.float32, -b_bound, b_bound)
    return weight, bias


if __name__ == "__main__":
    key = jax.random.PRNGKey(0)
    k_a, k_b, k_c, k_p1, k_p2, k_p3 = jax.random.split(key, 6)

    # --- case A: 3-D input, N not a multiple of 128 (padded-N path, single-K) ---
    std_init, bias_init = 2.0, 0.5
    xA = jax.random.normal(k_a, (2, 8, 32), jnp.float32)
    wA, bA = init_linear_layer_params(k_p1, 32, 32)
    pA = prepare_linear_params(wA, bA, std_init=std_init, bias_init=bias_init)
    outA = jax.block_until_ready(linear_layer_apply(xA, pA))
    refA = std_init * (xA @ wA.T + bA) + bias_init
    np.testing.assert_allclose(np.asarray(outA), np.asarray(refA), rtol=1e-5, atol=1e-5)

    # --- case B: lane-dense N (no pad / no output slice), single-K fast path ----
    xB = jax.random.normal(k_b, (16, 128), jnp.float32)
    wB, bB = init_linear_layer_params(k_p2, 128, 128, freq_init=True)
    pB = prepare_linear_params(wB, bB, std_init=1.5, bias_init=-0.25)
    outB = jax.block_until_ready(linear_layer_apply(xB, pB))
    refB = 1.5 * (xB @ wB.T + bB) - 0.25
    np.testing.assert_allclose(np.asarray(outB), np.asarray(refB), rtol=1e-5, atol=1e-5)

    # --- case C: K > 1024 exercises the multi-K accumulator path ----------------
    xC = jax.random.normal(k_c, (8, 1536), jnp.float32)
    wC, bC = init_linear_layer_params(k_p3, 1536, 64, is_first=True)
    pC = prepare_linear_params(wC, bC, std_init=0.5, bias_init=1.0)
    outC = jax.block_until_ready(linear_layer_apply(xC, pC))
    refC = 0.5 * (xC @ wC.T + bC) + 1.0
    np.testing.assert_allclose(np.asarray(outC), np.asarray(refC), rtol=1e-5, atol=1e-5)

    print("KERNEL_OK")
</pallas_src>

<mosaic_0001>
module attributes {stable_mosaic.version = 11 : i64} {
  func.func @_linear_kernel_single_k(%arg0: i32, %arg1: i32, %arg2: memref<16x32xf32, #tpu.memory_space<vmem>>, %arg3: memref<32x128xf32, #tpu.memory_space<vmem>>, %arg4: memref<1x128xf32, #tpu.memory_space<vmem>>, %arg5: memref<16x128xf32, #tpu.memory_space<vmem>>) attributes {dimension_semantics = [#tpu.dimension_semantics<parallel>, #tpu.dimension_semantics<parallel>], iteration_bounds = array<i64: 1, 1>, scalar_prefetch = 0 : i64, scratch_operands = 0 : i64, tpu.core_type = #tpu.core_type<tc>, window_params = [{transform_indices = @transform_0, window_bounds = array<i64: 16, 32>}, {transform_indices = @transform_1, window_bounds = array<i64: 32, 128>}, {transform_indices = @transform_2, window_bounds = array<i64: 1, 128>}, {transform_indices = @transform_3, window_bounds = array<i64: 16, 128>}]} {
    %c0 = arith.constant 0 : index
    %c0_0 = arith.constant 0 : index
    %0 = vector.load %arg2[%c0, %c0_0] : memref<16x32xf32, #tpu.memory_space<vmem>>, vector<16x32xf32>
    %c0_1 = arith.constant 0 : index
    %c0_2 = arith.constant 0 : index
    %1 = vector.load %arg3[%c0_1, %c0_2] : memref<32x128xf32, #tpu.memory_space<vmem>>, vector<32x128xf32>
    %cst = arith.constant dense<0.000000e+00> : vector<16x128xf32>
    %2 = tpu.matmul %0, %1, %cst {dimension_numbers = #tpu.dot_dimension_numbers<[1], [0], [0], [1], [0, 0, 1, 1], [], []>} : vector<16x32xf32>, vector<32x128xf32>, vector<16x128xf32> -> vector<16x128xf32>
    %c0_3 = arith.constant 0 : index
    %c0_4 = arith.constant 0 : index
    %3 = vector.load %arg4[%c0_3, %c0_4] : memref<1x128xf32, #tpu.memory_space<vmem>>, vector<1x128xf32>
    %4 = vector.broadcast %3 : vector<1x128xf32> to vector<16x128xf32>
    %5 = arith.addf %2, %4 : vector<16x128xf32>
    %c0_5 = arith.constant 0 : index
    %c0_6 = arith.constant 0 : index
    %6 = vector.load %arg5[%c0_5, %c0_6] : memref<16x128xf32, #tpu.memory_space<vmem>>, vector<16x128xf32>
    tpu.vector_store %arg5[%c0_5, %c0_6], %5 {strides = array<i32>} : memref<16x128xf32, #tpu.memory_space<vmem>>, vector<16x128xf32>,
    return
  }
  func.func @transform_0(%arg0: i32, %arg1: i32) -> (i32, i32) {
    %c0_i32 = arith.constant 0 : i32
    %c0_i32_0 = arith.constant 0 : i32
    return %arg0, %c0_i32 : i32, i32
  }
  func.func @transform_1(%arg0: i32, %arg1: i32) -> (i32, i32) {
    %c0_i32 = arith.constant 0 : i32
    %c0_i32_0 = arith.constant 0 : i32
    return %c0_i32, %arg1 : i32, i32
  }
  func.func @transform_2(%arg0: i32, %arg1: i32) -> (i32, i32) {
    %c0_i32 = arith.constant 0 : i32
    %c0_i32_0 = arith.constant 0 : i32
    return %c0_i32, %arg1 : i32, i32
  }
  func.func @transform_3(%arg0: i32, %arg1: i32) -> (i32, i32) {
    %c0_i32 = arith.constant 0 : i32
    return %arg0, %arg1 : i32, i32
  }
}

</mosaic_0001>

<bundles_post_ra>
// kernel: tpu_custom_call.1
= control target key start
LH: loop header
LB: loop body
LE: loop exit
PB: predicated region body
PF: predicated region fallthrough
CT: control target
= control target key end

     0   :  { %8 = vsyncpa [#allocation3], 0  ;;  %s245_s0 = inlined_call_operand.hbm [shape: f32[16,32], index: 0, kind: input, shape index: {}]   ;;  %s246_s1 = inlined_call_operand.hbm [shape: f32[32,128], index: 1, kind: input, shape index: {}]   ;;  %s247_s2 = inlined_call_operand.vmem [shape: f32[1,128], index: 2, kind: input, shape index: {}]   ;;  %s248_s3 = inlined_call_operand.hbm [shape: f32[16,128], index: 3, kind: output, shape index: {}]  }
   0x1   :  { %9 = vsyncpa [#allocation6], 0 }
   0x2   :  { %10 = vsyncpa [#allocation4], 0  ;;  %s15_s14 = sshll.u32 %s245_s0, 4  ;;  %s199_s15 = smov [#allocation2]   ;;  %s16_s14 = int_to_ptr.hbm [resolvable:$true] %s15_s14 }
   0x3   :  { %s17_s16 = sshll.u32 %s199_s15, 4  ;;  %s28_s19 = sshll.u32 %s246_s1, 4  ;;  %s18_s16 = int_to_ptr.vmem [resolvable:$true] %s17_s16  ;;  %s29_s19 = int_to_ptr.hbm [resolvable:$true] %s28_s19 }
   0x4   :  { %s200_s20 = smov 128   ;;  %s201_s21 = smov 8  }
   0x5   :  { %23 = dma.hbm_to_vmem [thread:$0]  %s16_s14, 256, %s18_s16, [#allocation3], %s200_s20, %s200_s20, %s201_s21  }
   0x6   :  { %s202_s22 = smov [#allocation5]  }
   0x7   :  { %s30_s23 = sshll.u32 %s202_s22, 4  ;;  %s31_s23 = int_to_ptr.vmem [resolvable:$true] %s30_s23 }
   0x8   :  { %36 = dma.hbm_to_vmem [thread:$0]  %s29_s19, 512, %s31_s23, [#allocation6], %s200_s20, %s200_s20, %s201_s21  }
   0x9   :  { %193 = dma.done.wait [#allocation3], 256  }
   0xa   :  { %194 = vsyncadd [#allocation3], 4294967040 }
   0xb   :  { %195 = dma.done.wait [#allocation6], 512  }
   0xc   :  { %196 = vsyncadd [#allocation6], 4294966784  ;;  %v52_v0 = vld [vmem:[#allocation5 + $0x18] sm:$0xff]  ;;  %v51_v1 = vld [vmem:[#allocation5 + $0x10] sm:$0xff]  ;;  %vm57_vm0 = vcmask 261120   ;;  %s203_s24 = smov [#allocation7]  }
   0xd   :  { %76 = vmatpush.msra.mxu0 %v52_v0  ;;  %111 = vmatpush.msra.mxu1 %v52_v0  ;;  %v50_v2 = vld [vmem:[#allocation5 + $0x8] sm:$0xff]  ;;  %v49_v3 = vld [vmem:[#allocation5] sm:$0xff]  ;;  %v47_v4 = vld [vmem:[#allocation2] sm:$0xff]  ;;  %s93_s25 = sshll.u32 %s203_s24, 4  ;;  %s95_s28 = sshll.u32 %s248_s3, 4  ;;  %s94_s25 = int_to_ptr.vmem [resolvable:$true] %s93_s25  ;;  %s96_s28 = int_to_ptr.hbm [resolvable:$true] %s95_s28 }
   0xe   :  { %v48_v5 = vld [vmem:[#allocation2 + $0x8] sm:$0xff]  ;;  %v120_v6 = vld [vmem:[%s247_s2] ss:$0 sm:$0xff] }
   0xf   :  { %77 = vmatpush.msra.mxu0 %v51_v1  ;;  %112 = vmatpush.msra.mxu1 %v51_v1 }
  0x11   :  { %78 = vmatpush.msra.mxu0 %v50_v2  ;;  %113 = vmatpush.msra.mxu1 %v50_v2 }
  0x13   :  { %79 = vmatpush.msra.mxu0 %v49_v3  ;;  %114 = vmatpush.msra.mxu1 %v49_v3 }
  0x14   :  { %109 = vmatmul.msk.f32.vlgmr.msra.gmra.mxu0 %vm57_vm0, %v47_v4  ;;  %110 = vmatmul.msk.f32.vlgmr.msra.gmra.mxu1 %vm57_vm0, %v48_v5 }
  0x91   :  { %v81_v7 = vpop.f32.mrf.mxu0  ;;  %v84_v8 = vpop.f32.mrf.mxu1 }
  0x92   :  { %v82_v9 = vadd.f32 %v120_v6, %v81_v7  ;;  %v85_v10 = vadd.f32 %v120_v6, %v84_v8 }
  0x94   :  { %87 = vst [vmem:[#allocation7] sm:$0xff] %v82_v9 }
  0x95   :  { %88 = vst [vmem:[#allocation7 + $0x8] sm:$0xff] %v85_v10 }
  0x96   :  { %101 = dma.vmem_to_hbm [thread:$0]  %s94_s25, 256, %s96_s28, [#allocation4], %s200_s20, %s200_s20, %s201_s21  }
  0x97   :  { %197 = dma.done.wait [#allocation4], 256  }
  0x98   :  { %198 = vsyncadd [#allocation4], 4294967040 }
  0x99   :  { %106 = vsyncpa [#allocation3], 1 }
  0x9a   :  { %107 = vsyncpa [#allocation6], 1 }
  0x9b   :  { %108 = vsyncpa [#allocation4], 1 }

</bundles_post_ra>
